<compile_context>
chip_gen: v7x
topology: tpu7x:2x2x1
jax: 0.10.0
libtpu: 0.0.40
codegen_flags: <defaults>
</compile_context>

<pallas_src>
import math
import jax
import jax.numpy as jnp
from jax.experimental import pallas as pl
from jax.experimental.pallas import tpu as pltpu

# ----------------------------- configuration --------------------------------
B = 2                  # batch
IMG = 16               # H = W (multiple of patch size -> bicubic resize is identity)
PATCH = 4              # stand-in patch size (real DINOv2 uses 14)
C = 32                 # stand-in embed dim (real vit_small uses 384)
NH = 4                 # len(key_depths) == number of heads
KS = 3                 # `ks` constructor argument (circular conv kernel size)
VIRTUAL_BS = 8         # BatchNormLocal virtual batch size
NORM_EPS = 1e-6
RATIO = 1.0 / math.sqrt(2.0)      # ResidualBlock ratio
HP = IMG // PATCH
L = HP * HP                       # tokens per image
M = B * L                         # flattened batch*token axis (rows / sublanes)
NHC = NH * C                      # stacked head-channel axis (lanes = 128)
PD = 3 * PATCH * PATCH            # flattened patch pixel dim

assert math.ceil(B / VIRTUAL_BS) == 1, "BatchNormLocal implemented for G == 1"


# ------------------------------ kernel helpers -------------------------------
def _leaky_relu(x):
    return jnp.where(x >= 0.0, x, 0.2 * x)


def _bn_local(x, gamma, beta):
    # BatchNormLocal with G = ceil(B / virtual_bs) = 1: per-(head,channel) stats
    # over the whole batch*length (sublane) axis, biased variance, f32 math,
    # rsqrt on the EUP slot.
    inv_n = 1.0 / x.shape[0]
    mean = jnp.sum(x, axis=0, keepdims=True) * inv_n
    ex2 = jnp.sum(x * x, axis=0, keepdims=True) * inv_n
    var = jnp.maximum(ex2 - mean * mean, 0.0)
    return (x - mean) * jax.lax.rsqrt(var + NORM_EPS) * gamma + beta


# ------------------------- single fused forward kernel -----------------------
def _dino_disc_kernel(patch_ref, wem_ref, bem_ref, wcls_ref, bcls_ref,
                      wdep_ref, bdep_ref, w1_ref, w2_ref, w3_ref,
                      vec_ref, b3_ref, out_ref):
    # patch_ref : (M, PD)   f32   flattened patch pixels (preprocess folded into wem)
    # wem_ref   : (PD, C)   bf16  effective patch-embed weight
    # bem_ref   : (1, C)    f32
    # wcls_ref  : (C, C)    bf16  cls-token projection (stub)
    # bcls_ref  : (1, C)    f32
    # wdep_ref  : (C, NHC)  bf16  NH depth projections stacked along lanes
    # bdep_ref  : (1, NHC)  f32
    # w1_ref    : (NHC, NHC)     bf16  block-diag per-head Conv1d(k=1), transposed
    # w2_ref    : (KS, NHC, NHC) bf16  block-diag per-tap circular-conv, transposed
    # w3_ref    : (NHC, NH)      bf16  per-head final 1x1 conv, one column per head
    # vec_ref   : (6, NHC)  f32  rows = [b1, g1, be1, b2, g2, be2]
    # b3_ref    : (1, NH)   f32
    # out_ref   : (M, NH)   f32
    f32, bf16 = jnp.float32, jnp.bfloat16

    # ---------- DINOv2 stand-in backbone (patch embed + cls + depth proj) -------
    patches = patch_ref[...]                                              # (M, PD)
    tokens = jnp.dot(patches.astype(bf16), wem_ref[...],
                     preferred_element_type=f32) + bem_ref[...]           # (M, C)
    tok3 = tokens.reshape(B, L, C)
    cls_in = jnp.mean(tok3, axis=1)                                       # (B, C)
    cls = jnp.tanh(jnp.dot(cls_in.astype(bf16), wcls_ref[...],
                           preferred_element_type=f32) + bcls_ref[...])   # (B, C)
    pt = jnp.tanh(jnp.dot(tokens.astype(bf16), wdep_ref[...],
                          preferred_element_type=f32) + bdep_ref[...])    # (M, NHC)
    ct = jnp.tanh(jnp.dot(cls.astype(bf16), wdep_ref[...],
                          preferred_element_type=f32) + bdep_ref[...])    # (B, NHC)
    x = (pt.reshape(B, L, NHC) + ct[:, None, :]).reshape(M, NHC)          # (M, NHC)

    b1, g1, be1 = vec_ref[0:1, :], vec_ref[1:2, :], vec_ref[2:3, :]
    b2, g2, be2 = vec_ref[3:4, :], vec_ref[4:5, :], vec_ref[5:6, :]

    # ---- block 1: all heads' SpectralConv1d(k=1) as ONE block-diag MXU matmul
    #      + BatchNormLocal + LeakyReLU(0.2)
    y = jnp.dot(x.astype(bf16), w1_ref[...], preferred_element_type=f32) + b1
    y = _leaky_relu(_bn_local(y, g1, be1))                                # (M, NHC)

    # ---- ResidualBlock( SpectralConv1d(ks, circular) + BN + LeakyReLU ) --------
    # (B, L, NHC) view: pltpu.roll on axis=1 wraps *per image*, so no boundary
    # masks / iota / `% L` are needed.  Tap k reads token (t + k - KS//2) mod L.
    y3 = y.reshape(B, L, NHC)
    z = jnp.dot(y.astype(bf16), w2_ref[KS // 2], preferred_element_type=f32) + b2
    for k in range(KS):
        d = k - KS // 2
        if d == 0:
            continue
        ysh = pltpu.roll(y3, (-d) % L, 1)          # rows: y[b, (t + d) mod L, :]
        z = z + jnp.dot(ysh.reshape(M, NHC).astype(bf16), w2_ref[k],
                        preferred_element_type=f32)
    z = _leaky_relu(_bn_local(z, g2, be2))
    z = (z + y) * RATIO                            # ResidualBlock

    # ---- final SpectralConv1d(C -> 1, k=1), one column per head ----------------
    # TODO(synk): output last dim is NH=4 lanes (masked store) and the wrapper does
    # one tiny (B,L,NH)->(B,NH,L) permute; negligible at 512 B.
    out_ref[...] = (jnp.dot(z.astype(bf16), w3_ref[...],
                            preferred_element_type=f32) + b3_ref[...])


def fused_forward(patches, p):
    """patches: (M, PD) f32.  Returns (M, NH) per-token, per-head logits."""
    vmem = lambda: pl.BlockSpec(memory_space=pltpu.MemorySpace.VMEM)
    return pl.pallas_call(
        _dino_disc_kernel,
        out_shape=jax.ShapeDtypeStruct((M, NH), jnp.float32),
        in_specs=[vmem() for _ in range(12)],
        out_specs=vmem(),
    )(patches, p['w_embed_eff'], p['b_embed_eff'], p['w_cls'], p['b_cls'],
      p['w_depth_stk'], p['b_depth_row'], p['w1bdT'], p['w2bdT'], p['w3cols'],
      p['vecs'], p['b3row'])


# ----------------------- spectral norm & parameter init ----------------------
def _l2normalize(v, eps=1e-12):
    return v / jnp.maximum(jnp.linalg.norm(v), eps)


def _spectral_normalize(w, key, n_power_iterations=1, eps=1e-12):
    # Mirrors torch SpectralNorm (dim=0, 1 power iteration) applied once at init.
    out_ch = w.shape[0]
    wm = w.reshape(out_ch, -1)
    ku, kv = jax.random.split(key)
    u = _l2normalize(jax.random.normal(ku, (out_ch,), jnp.float32), eps)
    v = _l2normalize(jax.random.normal(kv, (wm.shape[1],), jnp.float32), eps)
    for _ in range(n_power_iterations):
        v = _l2normalize(wm.T @ u, eps)
        u = _l2normalize(wm @ v, eps)
    sigma = u @ (wm @ v)
    return w / sigma


def init_params(key):
    keys = iter(jax.random.split(key, 64))
    nxt = lambda: next(keys)
    p = {}

    # registered buffers x_scale / x_shift -- folded exactly into the patch embed.
    mean = jnp.array([0.485, 0.456, 0.406], jnp.float32)
    std = jnp.array([0.229, 0.224, 0.225], jnp.float32)
    x_scale = 0.5 / std
    x_shift = (0.5 - mean) / std

    # deterministic DINOv2 stand-in backbone (patch flatten order: ch, pi, pj)
    w_embed = 0.1 * jax.random.normal(nxt(), (PD, C), jnp.float32)
    b_embed = 0.1 * jax.random.normal(nxt(), (C,), jnp.float32)
    scale_pp = jnp.repeat(x_scale, PATCH * PATCH)          # per-pixel scale, ch-major
    shift_pp = jnp.repeat(x_shift, PATCH * PATCH)
    p['w_embed_eff'] = (w_embed * scale_pp[:, None]).astype(jnp.bfloat16)
    p['b_embed_eff'] = (b_embed + shift_pp @ w_embed)[None, :]            # (1, C) f32
    p['w_cls'] = (0.1 * jax.random.normal(nxt(), (C, C), jnp.float32)).astype(jnp.bfloat16)
    p['b_cls'] = (0.1 * jax.random.normal(nxt(), (C,), jnp.float32))[None, :]
    w_depth = 0.1 * jax.random.normal(nxt(), (NH, C, C), jnp.float32)
    b_depth = 0.1 * jax.random.normal(nxt(), (NH, C), jnp.float32)
    # stacked along the lane axis: column block h = w_depth[h]
    p['w_depth_stk'] = jnp.concatenate([w_depth[h] for h in range(NH)],
                                       axis=1).astype(jnp.bfloat16)       # (C, NHC)
    p['b_depth_row'] = b_depth.reshape(1, NHC)                            # (1, NHC)

    # discriminator heads -> fused block-diagonal / packed forms (fine at NHC=128;
    # see module-header TODO for real DINOv2 sizes).
    w1bdT = jnp.zeros((NHC, NHC), jnp.float32)
    w2bdT = jnp.zeros((KS, NHC, NHC), jnp.float32)
    w3cols = jnp.zeros((NHC, NH), jnp.float32)
    b1, g1, be1, b2, g2, be2, b3 = ([] for _ in range(7))
    for h in range(NH):
        sl = slice(h * C, (h + 1) * C)

        w1o = 0.2 * jax.random.normal(nxt(), (C, C, 1), jnp.float32)
        w1h = _spectral_normalize(w1o, nxt())[:, :, 0]              # (C_out, C_in)
        w1bdT = w1bdT.at[sl, sl].set(w1h.T)                         # row-vector form
        b1.append(0.1 * jax.random.normal(nxt(), (C,), jnp.float32))
        g1.append(jnp.ones((C,), jnp.float32))
        be1.append(jnp.zeros((C,), jnp.float32))

        w2o = 0.2 * jax.random.normal(nxt(), (C, C, KS), jnp.float32)
        w2h = _spectral_normalize(w2o, nxt())                        # (C_out, C_in, KS)
        for k in range(KS):
            w2bdT = w2bdT.at[k, sl, sl].set(w2h[:, :, k].T)
        b2.append(0.1 * jax.random.normal(nxt(), (C,), jnp.float32))
        g2.append(jnp.ones((C,), jnp.float32))
        be2.append(jnp.zeros((C,), jnp.float32))

        w3o = 0.2 * jax.random.normal(nxt(), (1, C, 1), jnp.float32)
        w3h = _spectral_normalize(w3o, nxt())[:, :, 0]               # (1, C)
        w3cols = w3cols.at[sl, h].set(w3h[0])
        b3.append(0.1 * jax.random.normal(nxt(), (1,), jnp.float32))

    p['w1bdT'] = w1bdT.astype(jnp.bfloat16)
    p['w2bdT'] = w2bdT.astype(jnp.bfloat16)
    p['w3cols'] = w3cols.astype(jnp.bfloat16)
    p['vecs'] = jnp.stack([jnp.concatenate(v) for v in (b1, g1, be1, b2, g2, be2)])
    p['b3row'] = jnp.concatenate(b3)[None, :]
    return p


# -------------------------------- full forward --------------------------------
def _forward_impl(x, params):
    # x: (B, 3, H, W) NCHW, H=W multiple of the patch size -> the bicubic
    # F.interpolate to (near_H, near_W) is an identity (and the stochastic
    # RandomCrop branch never triggers).  The preprocess affine is folded into the
    # effective patch-embed weights, so the raw image feeds the backbone stub.
    xf = x.astype(jnp.float32)
    patches = xf.reshape(B, 3, HP, PATCH, HP, PATCH)
    patches = patches.transpose(0, 2, 4, 1, 3, 5).reshape(M, PD)   # (M, PD), ch-major
    pred = fused_forward(patches, params)                          # (M, NH)
    # (M, NH) -> (B, L, NH) -> (B, NH, L) -> (B, NH*L): same ordering as
    # torch.cat([head(act).view(B, -1) for ...], dim=1).
    return pred.reshape(B, L, NH).transpose(0, 2, 1).reshape(B, NH * L)


dino_disc_v2_forward = jax.jit(_forward_impl)


if __name__ == "__main__":
    key = jax.random.PRNGKey(0)
    pkey, xkey = jax.random.split(key)
    params = init_params(pkey)
    x = jax.random.uniform(xkey, (B, 3, IMG, IMG), dtype=jnp.float32)

    out = dino_disc_v2_forward(x, params)
    out = jax.block_until_ready(out)
    assert out.shape == (B, NH * L), out.shape
    assert bool(jnp.all(jnp.isfinite(out)))
    print("KERNEL_OK")
</pallas_src>

<mosaic_0001>
module attributes {stable_mosaic.version = 11 : i64} {
  func.func @_dino_disc_kernel(%arg0: memref<32x48xf32, #tpu.memory_space<vmem>>, %arg1: memref<48x32xbf16, #tpu.memory_space<vmem>>, %arg2: memref<1x32xf32, #tpu.memory_space<vmem>>, %arg3: memref<32x32xbf16, #tpu.memory_space<vmem>>, %arg4: memref<1x32xf32, #tpu.memory_space<vmem>>, %arg5: memref<32x128xbf16, #tpu.memory_space<vmem>>, %arg6: memref<1x128xf32, #tpu.memory_space<vmem>>, %arg7: memref<128x128xbf16, #tpu.memory_space<vmem>>, %arg8: memref<3x128x128xbf16, #tpu.memory_space<vmem>>, %arg9: memref<128x4xbf16, #tpu.memory_space<vmem>>, %arg10: memref<6x128xf32, #tpu.memory_space<vmem>>, %arg11: memref<1x4xf32, #tpu.memory_space<vmem>>, %arg12: memref<32x4xf32, #tpu.memory_space<vmem>>) attributes {dimension_semantics = [], scalar_prefetch = 0 : i64, scratch_operands = 0 : i64, tpu.core_type = #tpu.core_type<tc>} {
    %c0 = arith.constant 0 : index
    %c0_0 = arith.constant 0 : index
    %0 = vector.load %arg0[%c0, %c0_0] : memref<32x48xf32, #tpu.memory_space<vmem>>, vector<32x48xf32>
    %1 = arith.truncf %0 : vector<32x48xf32> to vector<32x48xbf16>
    %c0_1 = arith.constant 0 : index
    %c0_2 = arith.constant 0 : index
    %2 = vector.load %arg1[%c0_1, %c0_2] : memref<48x32xbf16, #tpu.memory_space<vmem>>, vector<48x32xbf16>
    %cst = arith.constant dense<0.000000e+00> : vector<32x32xf32>
    %3 = tpu.matmul %1, %2, %cst {dimension_numbers = #tpu.dot_dimension_numbers<[1], [0], [0], [1], [0, 0, 1, 1], [], []>} : vector<32x48xbf16>, vector<48x32xbf16>, vector<32x32xf32> -> vector<32x32xf32>
    %c0_3 = arith.constant 0 : index
    %c0_4 = arith.constant 0 : index
    %4 = vector.load %arg2[%c0_3, %c0_4] : memref<1x32xf32, #tpu.memory_space<vmem>>, vector<1x32xf32>
    %5 = vector.broadcast %4 : vector<1x32xf32> to vector<32x32xf32>
    %6 = arith.addf %3, %5 : vector<32x32xf32>
    %7 = vector.shape_cast %6 : vector<32x32xf32> to vector<2x16x32xf32>
    %cst_5 = arith.constant dense<0.000000e+00> : vector<2x32xf32>
    %8 = vector.multi_reduction <add>, %7, %cst_5 [1] : vector<2x16x32xf32> to vector<2x32xf32>
    %cst_6 = arith.constant 1.600000e+01 : f32
    %9 = vector.broadcast %cst_6 : f32 to vector<2x32xf32>
    %10 = arith.divf %8, %9 : vector<2x32xf32>
    %11 = arith.truncf %10 : vector<2x32xf32> to vector<2x32xbf16>
    %c0_7 = arith.constant 0 : index
    %c0_8 = arith.constant 0 : index
    %12 = vector.load %arg3[%c0_7, %c0_8] : memref<32x32xbf16, #tpu.memory_space<vmem>>, vector<32x32xbf16>
    %cst_9 = arith.constant dense<0.000000e+00> : vector<2x32xf32>
    %13 = tpu.matmul %11, %12, %cst_9 {dimension_numbers = #tpu.dot_dimension_numbers<[1], [0], [0], [1], [0, 0, 1, 1], [], []>} : vector<2x32xbf16>, vector<32x32xbf16>, vector<2x32xf32> -> vector<2x32xf32>
    %c0_10 = arith.constant 0 : index
    %c0_11 = arith.constant 0 : index
    %14 = vector.load %arg4[%c0_10, %c0_11] : memref<1x32xf32, #tpu.memory_space<vmem>>, vector<1x32xf32>
    %15 = vector.broadcast %14 : vector<1x32xf32> to vector<2x32xf32>
    %16 = arith.addf %13, %15 : vector<2x32xf32>
    %17 = math.tanh %16 : vector<2x32xf32>
    %18 = arith.truncf %6 : vector<32x32xf32> to vector<32x32xbf16>
    %c0_12 = arith.constant 0 : index
    %c0_13 = arith.constant 0 : index
    %19 = vector.load %arg5[%c0_12, %c0_13] : memref<32x128xbf16, #tpu.memory_space<vmem>>, vector<32x128xbf16>
    %cst_14 = arith.constant dense<0.000000e+00> : vector<32x128xf32>
    %20 = tpu.matmul %18, %19, %cst_14 {dimension_numbers = #tpu.dot_dimension_numbers<[1], [0], [0], [1], [0, 0, 1, 1], [], []>} : vector<32x32xbf16>, vector<32x128xbf16>, vector<32x128xf32> -> vector<32x128xf32>
    %c0_15 = arith.constant 0 : index
    %c0_16 = arith.constant 0 : index
    %21 = vector.load %arg6[%c0_15, %c0_16] : memref<1x128xf32, #tpu.memory_space<vmem>>, vector<1x128xf32>
    %22 = vector.broadcast %21 : vector<1x128xf32> to vector<32x128xf32>
    %23 = arith.addf %20, %22 : vector<32x128xf32>
    %24 = math.tanh %23 : vector<32x128xf32>
    %25 = arith.truncf %17 : vector<2x32xf32> to vector<2x32xbf16>
    %c0_17 = arith.constant 0 : index
    %c0_18 = arith.constant 0 : index
    %26 = vector.load %arg5[%c0_17, %c0_18] : memref<32x128xbf16, #tpu.memory_space<vmem>>, vector<32x128xbf16>
    %cst_19 = arith.constant dense<0.000000e+00> : vector<2x128xf32>
    %27 = tpu.matmul %25, %26, %cst_19 {dimension_numbers = #tpu.dot_dimension_numbers<[1], [0], [0], [1], [0, 0, 1, 1], [], []>} : vector<2x32xbf16>, vector<32x128xbf16>, vector<2x128xf32> -> vector<2x128xf32>
    %c0_20 = arith.constant 0 : index
    %c0_21 = arith.constant 0 : index
    %28 = vector.load %arg6[%c0_20, %c0_21] : memref<1x128xf32, #tpu.memory_space<vmem>>, vector<1x128xf32>
    %29 = vector.broadcast %28 : vector<1x128xf32> to vector<2x128xf32>
    %30 = arith.addf %27, %29 : vector<2x128xf32>
    %31 = math.tanh %30 : vector<2x128xf32>
    %32 = vector.shape_cast %24 : vector<32x128xf32> to vector<2x16x128xf32>
    %33 = vector.shape_cast %31 : vector<2x128xf32> to vector<2x1x128xf32>
    %34 = vector.broadcast %33 : vector<2x1x128xf32> to vector<2x16x128xf32>
    %35 = arith.addf %32, %34 : vector<2x16x128xf32>
    %36 = vector.shape_cast %35 : vector<2x16x128xf32> to vector<32x128xf32>
    %c0_22 = arith.constant 0 : index
    %c0_23 = arith.constant 0 : index
    %37 = vector.load %arg10[%c0_22, %c0_23] : memref<6x128xf32, #tpu.memory_space<vmem>>, vector<1x128xf32>
    %c1 = arith.constant 1 : index
    %c0_24 = arith.constant 0 : index
    %38 = vector.load %arg10[%c1, %c0_24] : memref<6x128xf32, #tpu.memory_space<vmem>>, vector<1x128xf32>
    %c2 = arith.constant 2 : index
    %c0_25 = arith.constant 0 : index
    %39 = vector.load %arg10[%c2, %c0_25] : memref<6x128xf32, #tpu.memory_space<vmem>>, vector<1x128xf32>
    %c3 = arith.constant 3 : index
    %c0_26 = arith.constant 0 : index
    %40 = vector.load %arg10[%c3, %c0_26] : memref<6x128xf32, #tpu.memory_space<vmem>>, vector<1x128xf32>
    %c4 = arith.constant 4 : index
    %c0_27 = arith.constant 0 : index
    %41 = vector.load %arg10[%c4, %c0_27] : memref<6x128xf32, #tpu.memory_space<vmem>>, vector<1x128xf32>
    %c5 = arith.constant 5 : index
    %c0_28 = arith.constant 0 : index
    %42 = vector.load %arg10[%c5, %c0_28] : memref<6x128xf32, #tpu.memory_space<vmem>>, vector<1x128xf32>
    %43 = arith.truncf %36 : vector<32x128xf32> to vector<32x128xbf16>
    %c0_29 = arith.constant 0 : index
    %c0_30 = arith.constant 0 : index
    %44 = vector.load %arg7[%c0_29, %c0_30] : memref<128x128xbf16, #tpu.memory_space<vmem>>, vector<128x128xbf16>
    %cst_31 = arith.constant dense<0.000000e+00> : vector<32x128xf32>
    %45 = tpu.matmul %43, %44, %cst_31 {dimension_numbers = #tpu.dot_dimension_numbers<[1], [0], [0], [1], [0, 0, 1, 1], [], []>} : vector<32x128xbf16>, vector<128x128xbf16>, vector<32x128xf32> -> vector<32x128xf32>
    %46 = vector.broadcast %37 : vector<1x128xf32> to vector<32x128xf32>
    %47 = arith.addf %45, %46 : vector<32x128xf32>
    %cst_32 = arith.constant dense<0.000000e+00> : vector<128xf32>
    %48 = vector.multi_reduction <add>, %47, %cst_32 [0] : vector<32x128xf32> to vector<128xf32>
    %49 = vector.shape_cast %48 : vector<128xf32> to vector<1x128xf32>
    %cst_33 = arith.constant 3.125000e-02 : f32
    %50 = vector.broadcast %cst_33 : f32 to vector<1x128xf32>
    %51 = arith.mulf %49, %50 : vector<1x128xf32>
    %52 = arith.mulf %47, %47 : vector<32x128xf32>
    %cst_34 = arith.constant dense<0.000000e+00> : vector<128xf32>
    %53 = vector.multi_reduction <add>, %52, %cst_34 [0] : vector<32x128xf32> to vector<128xf32>
    %54 = vector.shape_cast %53 : vector<128xf32> to vector<1x128xf32>
    %cst_35 = arith.constant 3.125000e-02 : f32
    %55 = vector.broadcast %cst_35 : f32 to vector<1x128xf32>
    %56 = arith.mulf %54, %55 : vector<1x128xf32>
    %57 = arith.mulf %51, %51 : vector<1x128xf32>
    %58 = arith.subf %56, %57 : vector<1x128xf32>
    %cst_36 = arith.constant 0.000000e+00 : f32
    %59 = vector.broadcast %cst_36 : f32 to vector<1x128xf32>
    %60 = arith.maximumf %58, %59 : vector<1x128xf32>
    %61 = vector.broadcast %51 : vector<1x128xf32> to vector<32x128xf32>
    %62 = arith.subf %47, %61 : vector<32x128xf32>
    %cst_37 = arith.constant 9.99999997E-7 : f32
    %63 = vector.broadcast %cst_37 : f32 to vector<1x128xf32>
    %64 = arith.addf %60, %63 : vector<1x128xf32>
    %65 = math.rsqrt %64 : vector<1x128xf32>
    %66 = vector.broadcast %65 : vector<1x128xf32> to vector<32x128xf32>
    %67 = arith.mulf %62, %66 : vector<32x128xf32>
    %68 = vector.broadcast %38 : vector<1x128xf32> to vector<32x128xf32>
    %69 = arith.mulf %67, %68 : vector<32x128xf32>
    %70 = vector.broadcast %39 : vector<1x128xf32> to vector<32x128xf32>
    %71 = arith.addf %69, %70 : vector<32x128xf32>
    %cst_38 = arith.constant 0.000000e+00 : f32
    %72 = vector.broadcast %cst_38 : f32 to vector<32x128xf32>
    %73 = arith.cmpf oge, %71, %72 : vector<32x128xf32>
    %cst_39 = arith.constant 2.000000e-01 : f32
    %74 = vector.broadcast %cst_39 : f32 to vector<32x128xf32>
    %75 = arith.mulf %74, %71 : vector<32x128xf32>
    %76 = arith.select %73, %71, %75 : vector<32x128xi1>, vector<32x128xf32>
    %77 = vector.shape_cast %76 : vector<32x128xf32> to vector<2x16x128xf32>
    %78 = arith.truncf %76 : vector<32x128xf32> to vector<32x128xbf16>
    %c1_40 = arith.constant 1 : index
    %c0_41 = arith.constant 0 : index
    %c0_42 = arith.constant 0 : index
    %79 = vector.load %arg8[%c1_40, %c0_41, %c0_42] : memref<3x128x128xbf16, #tpu.memory_space<vmem>>, vector<1x128x128xbf16>
    %80 = vector.shape_cast %79 : vector<1x128x128xbf16> to vector<128x128xbf16>
    %cst_43 = arith.constant dense<0.000000e+00> : vector<32x128xf32>
    %81 = tpu.matmul %78, %80, %cst_43 {dimension_numbers = #tpu.dot_dimension_numbers<[1], [0], [0], [1], [0, 0, 1, 1], [], []>} : vector<32x128xbf16>, vector<128x128xbf16>, vector<32x128xf32> -> vector<32x128xf32>
    %82 = vector.broadcast %40 : vector<1x128xf32> to vector<32x128xf32>
    %83 = arith.addf %81, %82 : vector<32x128xf32>
    %c1_i32 = arith.constant 1 : i32
    %84 = tpu.dynamic_rotate %77 by %c1_i32 dim 1 : vector<2x16x128xf32>, i32 -> vector<2x16x128xf32>
    %85 = vector.shape_cast %84 : vector<2x16x128xf32> to vector<32x128xf32>
    %86 = arith.truncf %85 : vector<32x128xf32> to vector<32x128xbf16>
    %c0_44 = arith.constant 0 : index
    %c0_45 = arith.constant 0 : index
    %c0_46 = arith.constant 0 : index
    %87 = vector.load %arg8[%c0_44, %c0_45, %c0_46] : memref<3x128x128xbf16, #tpu.memory_space<vmem>>, vector<1x128x128xbf16>
    %88 = vector.shape_cast %87 : vector<1x128x128xbf16> to vector<128x128xbf16>
    %cst_47 = arith.constant dense<0.000000e+00> : vector<32x128xf32>
    %89 = tpu.matmul %86, %88, %cst_47 {dimension_numbers = #tpu.dot_dimension_numbers<[1], [0], [0], [1], [0, 0, 1, 1], [], []>} : vector<32x128xbf16>, vector<128x128xbf16>, vector<32x128xf32> -> vector<32x128xf32>
    %90 = arith.addf %83, %89 : vector<32x128xf32>
    %c15_i32 = arith.constant 15 : i32
    %91 = tpu.dynamic_rotate %77 by %c15_i32 dim 1 : vector<2x16x128xf32>, i32 -> vector<2x16x128xf32>
    %92 = vector.shape_cast %91 : vector<2x16x128xf32> to vector<32x128xf32>
    %93 = arith.truncf %92 : vector<32x128xf32> to vector<32x128xbf16>
    %c2_48 = arith.constant 2 : index
    %c0_49 = arith.constant 0 : index
    %c0_50 = arith.constant 0 : index
    %94 = vector.load %arg8[%c2_48, %c0_49, %c0_50] : memref<3x128x128xbf16, #tpu.memory_space<vmem>>, vector<1x128x128xbf16>
    %95 = vector.shape_cast %94 : vector<1x128x128xbf16> to vector<128x128xbf16>
    %cst_51 = arith.constant dense<0.000000e+00> : vector<32x128xf32>
    %96 = tpu.matmul %93, %95, %cst_51 {dimension_numbers = #tpu.dot_dimension_numbers<[1], [0], [0], [1], [0, 0, 1, 1], [], []>} : vector<32x128xbf16>, vector<128x128xbf16>, vector<32x128xf32> -> vector<32x128xf32>
    %97 = arith.addf %90, %96 : vector<32x128xf32>
    %cst_52 = arith.constant dense<0.000000e+00> : vector<128xf32>
    %98 = vector.multi_reduction <add>, %97, %cst_52 [0] : vector<32x128xf32> to vector<128xf32>
    %99 = vector.shape_cast %98 : vector<128xf32> to vector<1x128xf32>
    %cst_53 = arith.constant 3.125000e-02 : f32
    %100 = vector.broadcast %cst_53 : f32 to vector<1x128xf32>
    %101 = arith.mulf %99, %100 : vector<1x128xf32>
    %102 = arith.mulf %97, %97 : vector<32x128xf32>
    %cst_54 = arith.constant dense<0.000000e+00> : vector<128xf32>
    %103 = vector.multi_reduction <add>, %102, %cst_54 [0] : vector<32x128xf32> to vector<128xf32>
    %104 = vector.shape_cast %103 : vector<128xf32> to vector<1x128xf32>
    %cst_55 = arith.constant 3.125000e-02 : f32
    %105 = vector.broadcast %cst_55 : f32 to vector<1x128xf32>
    %106 = arith.mulf %104, %105 : vector<1x128xf32>
    %107 = arith.mulf %101, %101 : vector<1x128xf32>
    %108 = arith.subf %106, %107 : vector<1x128xf32>
    %cst_56 = arith.constant 0.000000e+00 : f32
    %109 = vector.broadcast %cst_56 : f32 to vector<1x128xf32>
    %110 = arith.maximumf %108, %109 : vector<1x128xf32>
    %111 = vector.broadcast %101 : vector<1x128xf32> to vector<32x128xf32>
    %112 = arith.subf %97, %111 : vector<32x128xf32>
    %cst_57 = arith.constant 9.99999997E-7 : f32
    %113 = vector.broadcast %cst_57 : f32 to vector<1x128xf32>
    %114 = arith.addf %110, %113 : vector<1x128xf32>
    %115 = math.rsqrt %114 : vector<1x128xf32>
    %116 = vector.broadcast %115 : vector<1x128xf32> to vector<32x128xf32>
    %117 = arith.mulf %112, %116 : vector<32x128xf32>
    %118 = vector.broadcast %41 : vector<1x128xf32> to vector<32x128xf32>
    %119 = arith.mulf %117, %118 : vector<32x128xf32>
    %120 = vector.broadcast %42 : vector<1x128xf32> to vector<32x128xf32>
    %121 = arith.addf %119, %120 : vector<32x128xf32>
    %cst_58 = arith.constant 0.000000e+00 : f32
    %122 = vector.broadcast %cst_58 : f32 to vector<32x128xf32>
    %123 = arith.cmpf oge, %121, %122 : vector<32x128xf32>
    %cst_59 = arith.constant 2.000000e-01 : f32
    %124 = vector.broadcast %cst_59 : f32 to vector<32x128xf32>
    %125 = arith.mulf %124, %121 : vector<32x128xf32>
    %126 = arith.select %123, %121, %125 : vector<32x128xi1>, vector<32x128xf32>
    %127 = arith.addf %126, %76 : vector<32x128xf32>
    %cst_60 = arith.constant 0.707106769 : f32
    %128 = vector.broadcast %cst_60 : f32 to vector<32x128xf32>
    %129 = arith.mulf %127, %128 : vector<32x128xf32>
    %130 = arith.truncf %129 : vector<32x128xf32> to vector<32x128xbf16>
    %c0_61 = arith.constant 0 : index
    %c0_62 = arith.constant 0 : index
    %131 = vector.load %arg9[%c0_61, %c0_62] : memref<128x4xbf16, #tpu.memory_space<vmem>>, vector<128x4xbf16>
    %cst_63 = arith.constant dense<0.000000e+00> : vector<32x4xf32>
    %132 = tpu.matmul %130, %131, %cst_63 {dimension_numbers = #tpu.dot_dimension_numbers<[1], [0], [0], [1], [0, 0, 1, 1], [], []>} : vector<32x128xbf16>, vector<128x4xbf16>, vector<32x4xf32> -> vector<32x4xf32>
    %c0_64 = arith.constant 0 : index
    %c0_65 = arith.constant 0 : index
    %133 = vector.load %arg11[%c0_64, %c0_65] : memref<1x4xf32, #tpu.memory_space<vmem>>, vector<1x4xf32>
    %134 = vector.broadcast %133 : vector<1x4xf32> to vector<32x4xf32>
    %135 = arith.addf %132, %134 : vector<32x4xf32>
    %c0_66 = arith.constant 0 : index
    %c0_67 = arith.constant 0 : index
    %136 = vector.load %arg12[%c0_66, %c0_67] : memref<32x4xf32, #tpu.memory_space<vmem>>, vector<32x4xf32>
    tpu.vector_store %arg12[%c0_66, %c0_67], %135 {strides = array<i32>} : memref<32x4xf32, #tpu.memory_space<vmem>>, vector<32x4xf32>,
    return
  }
}

</mosaic_0001>

<bundles_post_ra>
// kernel: _forward_impl.1
= control target key start
LH: loop header
LB: loop body
LE: loop exit
PB: predicated region body
PF: predicated region fallthrough
CT: control target
= control target key end

     0   :  { %vm79_vm0 = vcmask 392192   ;;  %v1544_v10 = vmov 0.0   ;;  %vm1545_vm1 = vmmov 0   ;;  %vm135_vm2 = vcmask 261120   ;;  %s1867_s1 = inlined_call_operand.vmem [shape: bf16[48,32], index: 1, kind: input, shape index: {}]   ;;  %s1868_s0 = inlined_call_operand.vmem [shape: f32[32,48], index: 0, kind: input, shape index: {}]   ;;  %s1869_s3 = inlined_call_operand.vmem [shape: bf16[32,32], index: 3, kind: input, shape index: {}]   ;;  %s1870_s5 = inlined_call_operand.vmem [shape: bf16[32,128], index: 5, kind: input, shape index: {}]   ;;  %s1871_s2 = inlined_call_operand.vmem [shape: f32[1,32], index: 2, kind: input, shape index: {}]   ;;  %s1872_s7 = inlined_call_operand.vmem [shape: bf16[128,128], index: 7, kind: input, shape index: {}]   ;;  %s1873_s4 = inlined_call_operand.vmem [shape: f32[1,32], index: 4, kind: input, shape index: {}]   ;;  %s1874_s6 = inlined_call_operand.vmem [shape: f32[1,128], index: 6, kind: input, shape index: {}]   ;;  %s1875_s8 = inlined_call_operand.vmem [shape: bf16[3,128,128], index: 8, kind: input, shape index: {}]   ;;  %s1876_s10 = inlined_call_operand.vmem [shape: f32[6,128], index: 10, kind: input, shape index: {}]   ;;  %s1877_s9 = inlined_call_operand.vmem [shape: bf16[128,4], index: 9, kind: input, shape index: {}]   ;;  %s1878_s11 = inlined_call_operand.vmem [shape: f32[1,4], index: 11, kind: input, shape index: {}]   ;;  %s1879_s12 = inlined_call_operand.vmem [shape: f32[32,4], index: 12, kind: output, shape index: {}]  }
   0x1   :  { %v1481_v0 = vld [vmem:[%s1867_s1] sm:$0xff]   ;;  %v1482_v1 = vld [vmem:[%s1867_s1 + $0x8] sm:$0xff]   ;;  %v1483_v4 = vld [vmem:[%s1867_s1 + $0x10] sm:$0xff]   ;;  %vm174_vm3 = vcmask 1041409   ;;  %vm1163_vm14 = vcmask 31744  }
   0x2   :  { %1332 = vmatprep.subr.bf16.mxu1 %v1481_v0  ;;  %v42_v2 = vld [vmem:[%s1868_s0] sm:$0xff]  ;;  %v43_v3 = vld [vmem:[%s1868_s0 + $0x8] sm:$0xff]  ;;  %v44_v6 = vld [vmem:[%s1868_s0 + $0x10] sm:$0xff] }
   0x3   :  { %1333 = vmatpush3.bf16.msra.mxu1 %v1481_v0  ;;  %v46_v5 = vpack.c.bf16 %v43_v3, %v42_v2  ;;  %v45_v7 = vld [vmem:[%s1868_s0 + $0x18] sm:$0xff]  ;;  %v1484_v9 = vld [vmem:[%s1869_s3] sm:$0xff]   ;;  %v1485_v11 = vld [vmem:[%s1869_s3 + $0x8] sm:$0xff]  }
   0x4   :  { %1334 = vmatprep.subr.bf16.mxu1 %v1482_v1  ;;  %v47_v8 = vpack.c.bf16 %v45_v7, %v44_v6  ;;  %v1486_v12 = vld [vmem:[%s1870_s5] sm:$0xff]   ;;  %v1487_v50 = vld [vmem:[%s1870_s5 + $0x8] sm:$0xff]   ;;  %v1491_v2 = vld [vmem:[%s1872_s7 + $0x18] sm:$0xff]  }
   0x5   :  { %1338 = vmatprep.mubr.msk.bf16.mxu1 %vm79_vm0, %v46_v5  ;;  %v1172_v13 = vld [vmem:[%s1871_s2] ss:$0 sm:$0xff]  ;;  %v1489_v0 = vld [vmem:[%s1872_s7 + $0x8] sm:$0xff]   ;;  %v1494_v5 = vld [vmem:[%s1872_s7 + $0x30] sm:$0xff]  }
   0x6   :  { %v1488_v51 = vld [vmem:[%s1872_s7] sm:$0xff]   ;;  %v1495_v6 = vld [vmem:[%s1872_s7 + $0x38] sm:$0xff]  }
   0x7   :  { %1335 = vmatpush3.bf16.msra.mxu1 %v1482_v1  ;;  %v1178_v52 = vld [vmem:[%s1873_s4] ss:$0 sm:$0xff]  ;;  %v1490_v1 = vld [vmem:[%s1872_s7 + $0x10] sm:$0xff]  }
   0x8   :  { %1336 = vmatprep.subr.bf16.mxu1 %v1483_v4  ;;  %v1492_v3 = vld [vmem:[%s1872_s7 + $0x20] sm:$0xff]  }
   0x9   :  { %v1182_v7 = vld [vmem:[%s1874_s6] ss:$0 sm:$0xff] }
   0xb   :  { %1337 = vmatpush3.bf16.msra.mxu1 %v1483_v4  ;;  %v1493_v4 = vld [vmem:[%s1872_s7 + $0x28] sm:$0xff]  }
   0xc   :  { %1342 = vmatprep.subr.bf16.mxu1 %v1544_v10 }
   0xe   :  { %1339 = vmatmul.mubr.msk.bf16.vlgmr.msra.gmra.mrb[0].mxu1 %vm79_vm0, %v47_v8 }
   0xf   :  { %1343 = vmatpush3.bf16.msra.mxu1 %v1484_v9  ;;  %1346 = vmatprep.mubr.msk.bf16.mxu1 %vm1545_vm1, %v1544_v10 }
  0x10   :  { %1344 = vmatprep.subr.bf16.mxu1 %v1544_v10 }
  0x13   :  { %1345 = vmatpush3.bf16.msra.mxu1 %v1485_v11 }
  0x14   :  { %1350 = vmatprep.subr.bf16.mxu1 %v1486_v12 }
  0xe1   :  { %v1340_v14 = vpop.f32.mrb[0].mxu1 }
  0xe2   :  { %v129_v15 = vadd.f32 %v1340_v14, %v1172_v13  ;;  %v120_v16 = vpop.f32.mrb[1].mxu1  ;;  %v366_v14 = vlaneseq }
  0xe3   :  { %v121_v17 = vadd.f32 %v1172_v13, %v120_v16  ;;  %v1341_v18 = vpop.f32.mrb[2].mxu1 }
  0xe4   :  { %v132_v19 = vadd.f32 %v1341_v18, %v1172_v13  ;;  %v123_v20 = vpop.f32.mrb[3].mxu1  ;;  %v145_v22 = vsel %vm135_vm2, %v129_v15, 0.0 }
  0xe5   :  { %v124_v21 = vadd.f32 %v1172_v13, %v123_v20  ;;  %v136_v25 = vsel %vm135_vm2, %v121_v17, 0.0  ;;  %v1688_v20 = vshrl.u32 %v366_v14, 7 }
  0xe6   :  { %v146_v23 = vsel %vm135_vm2, %v132_v19, 0.0  ;;  %v234_v24 = vpack.c.bf16 %v132_v19, %v129_v15 }
  0xe7   :  { %v147_v26 = vadd.f32 %v146_v23, %v145_v22  ;;  %v137_v27 = vsel %vm135_vm2, %v124_v21, 0.0  ;;  %v233_v28 = vpack.c.bf16 %v124_v21, %v121_v17  ;;  %vm715_vm8 = vcmp.lt.s32.totalorder %v1688_v20, 1 }
  0xe8   :  { %v138_v29 = vadd.f32 %v137_v27, %v136_v25  ;;  %v387_v25 = vsub.s32 0, %v1688_v20  ;;  %vm843_vm9 = vcmp.lt.s32.totalorder %v1688_v20, 7 }
  0xe9   :  { %v148_v30 = vrot.slane %v147_v26, 4 }
  0xea   :  { %v139_v31 = vrot.slane %v138_v29, 4 }
  0xeb   :  { %v149_v32 = vadd.f32 %v148_v30, %v147_v26 }
  0xec   :  { %v140_v33 = vadd.f32 %v139_v31, %v138_v29 }
  0xed   :  { %v150_v34 = vrot.slane %v149_v32, 2 }
  0xee   :  { %v141_v35 = vrot.slane %v140_v33, 2 }
  0xef   :  { %v151_v36 = vadd.f32 %v150_v34, %v149_v32 }
  0xf0   :  { %v142_v37 = vadd.f32 %v141_v35, %v140_v33 }
  0xf1   :  { %v152_v38 = vrot.slane %v151_v36, 1 }
  0xf2   :  { %v143_v39 = vrot.slane %v142_v37, 1 }
  0xf3   :  { %v153_v40 = vadd.f32 %v152_v38, %v151_v36 }
  0xf4   :  { %v144_v41 = vadd.f32 %v143_v39, %v142_v37 }
  0xf5   :  { %v156_v42 = vmul.f32 0.0625, %v153_v40 }
  0xf6   :  { %v155_v43 = vmul.f32 0.0625, %v144_v41  ;;  %v1496_v41 = vld [vmem:[%s1875_s8 + $0x40] sm:$0xff]  }
  0xf7   :  { %v158_v44 = vpack.c.bf16 %v156_v42, %v156_v42  ;;  %1386 = vmatprep.subr.bf16.mxu0 %v1496_v41  ;;  %v1497_v42 = vld [vmem:[%s1875_s8 + $0x48] sm:$0xff]  }
  0xf8   :  { %v157_v45 = vpack.c.bf16 %v155_v43, %v155_v43  ;;  %1387 = vmatpush3.bf16.msra.mxu0 %v1496_v41  ;;  %v1498_v43 = vld [vmem:[%s1875_s8 + $0x50] sm:$0xff]  }
  0xf9   :  { %v173_v46 = vunpack.c.l.b16 %v158_v44  ;;  %1388 = vmatprep.subr.bf16.mxu0 %v1497_v42  ;;  %v1499_v44 = vld [vmem:[%s1875_s8 + $0x58] sm:$0xff]  }
  0xfa   :  { %v172_v47 = vunpack.c.l.b16 %v157_v45  ;;  %v1500_v45 = vld [vmem:[%s1875_s8 + $0x60] sm:$0xff]  }
  0xfc   :  { %v175_v48 = vsel %vm174_vm3, %v173_v46, %v172_v47  ;;  %1389 = vmatpush3.bf16.msra.mxu0 %v1497_v42  ;;  %v1501_v46 = vld [vmem:[%s1875_s8 + $0x68] sm:$0xff]   ;;  %v1502_v47 = vld [vmem:[%s1875_s8 + $0x70] sm:$0xff]  }
  0xfd   :  { %v176_v49 = vpack.c.b16 %v175_v48, %v175_v48  ;;  %1390 = vmatprep.subr.bf16.mxu0 %v1498_v43  ;;  %v1503_v48 = vld [vmem:[%s1875_s8 + $0x78] sm:$0xff]  }
  0xff   :  { %1347 = vmatmul.mubr.msk.bf16.vlgmr.msra.gmra.mrb[4].mxu1 %vm135_vm2, %v176_v49  ;;  %v1719_v49 = vld [vmem:[%s1875_s8] sm:$0xff]  }
 0x100   :  { %1351 = vmatpush3.bf16.msra.mxu1 %v1486_v12  ;;  %1354 = vmatprep.mubr.msk.bf16.mxu1 %vm135_vm2, %v233_v28 }
 0x101   :  { %1352 = vmatprep.subr.bf16.mxu1 %v1487_v50  ;;  %1391 = vmatpush3.bf16.msra.mxu0 %v1498_v43 }
 0x102   :  { %1392 = vmatprep.subr.bf16.mxu0 %v1499_v44 }
 0x104   :  { %1353 = vmatpush3.bf16.msra.mxu1 %v1487_v50 }
 0x105   :  { %1358 = vmatprep.subr.bf16.mxu1 %v1544_v10  ;;  %1393 = vmatpush3.bf16.msra.mxu0 %v1499_v44 }
 0x106   :  { %1394 = vmatprep.subr.bf16.mxu0 %v1500_v45 }
 0x107   :  { %1355 = vmatmul.mubr.msk.bf16.vlgmr.msra.gmra.mrb[8].mxu1 %vm135_vm2, %v234_v24 }
 0x108   :  { %1359 = vmatpush3.bf16.msra.mxu1 %v1486_v12  ;;  %1362 = vmatprep.mubr.msk.bf16.mxu1 %vm1545_vm1, %v1544_v10  ;;  %v1546_v12 = vmov 1966171168  }
 0x109   :  { %1360 = vmatprep.subr.bf16.mxu1 %v1544_v10  ;;  %v364_v13 = vunpack.c.l.s4 %v1546_v12  ;;  %1395 = vmatpush3.bf16.msra.mxu0 %v1500_v45 }
 0x10a   :  { %1396 = vmatprep.subr.bf16.mxu0 %v1501_v46 }
 0x10b   :  { %v365_v19 = vunpack.c.0.s8 %v364_v13 }
 0x10c   :  { %1361 = vmatpush3.bf16.msra.mxu1 %v1487_v50  ;;  %v1188_v50 = vld [vmem:[%s1876_s10] ss:$0 sm:$0xff] }
 0x10d   :  { %1366 = vmatprep.subr.bf16.mxu1 %v1488_v51  ;;  %v368_v22 = vsub.s32 %v365_v19, %v1688_v20  ;;  %1397 = vmatpush3.bf16.msra.mxu0 %v1501_v46  ;;  %v1522_v20 = vld [vmem:[%s1877_s9 + $0x10] sm:$0xff]  }
 0x10e   :  { %1398 = vmatprep.subr.bf16.mxu0 %v1502_v47 }
 0x111   :  { %1399 = vmatpush3.bf16.msra.mxu0 %v1502_v47 }
 0x112   :  { %1400 = vmatprep.subr.bf16.mxu0 %v1503_v48 }
 0x115   :  { %1401 = vmatpush3.bf16.msra.mxu0 %v1503_v48 }
 0x116   :  { %1406 = vmatprep.subr.bf16.mxu0 %v1719_v49 }
 0x1d2   :  { %v226_v53 = vpop.f32.mrb[4].mxu1 }
 0x1d3   :  { %v227_v54 = vadd.f32 %v1178_v52, %v226_v53  ;;  %v1348_v55 = vpop.f32.mrb[5].mxu1 }
 0x1d4   :  { %v229_v56 = vpop.f32.mrb[6].mxu1 }
 0x1d5   :  { %1528 = vtanh.f32 %v227_v54  ;;  %v1349_v57 = vpop.f32.mrb[7].mxu1 }
 0x1da   :  { %v1356_v58 = vpop.f32.mrb[8].mxu1 }
 0x1db   :  { %v298_v59 = vpop.f32.mrb[9].mxu1  ;;  %v307_v18 = vadd.f32 %v1356_v58, %v1182_v7 }
 0x1dc   :  { %v1357_v60 = vpop.f32.mrb[10].mxu1  ;;  %v299_v16 = vadd.f32 %v1182_v7, %v298_v59 }
 0x1dd   :  { %v301_v61 = vpop.f32.mrb[11].mxu1  ;;  %v310_v21 = vadd.f32 %v1357_v60, %v1182_v7 }
 0x1de   :  { %v302_v17 = vadd.f32 %v1182_v7, %v301_v61 }
 0x1df   :  { %v1529_v62 = vpop.eup %1528 }
 0x1e0   :  { %v317_v63 = vpack.c.bf16 %v1529_v62, %v1529_v62 }
 0x1e2   :  { %1363 = vmatmul.mubr.msk.bf16.vlgmr.msra.gmra.mrb[12].mxu1 %vm135_vm2, %v317_v63 }
 0x1e3   :  { %1367 = vmatpush3.bf16.msra.mxu1 %v1488_v51 }
 0x1e4   :  { %1368 = vmatprep.subr.bf16.mxu1 %v1489_v0 }
 0x1e7   :  { %1369 = vmatpush3.bf16.msra.mxu1 %v1489_v0 }
 0x1e8   :  { %1370 = vmatprep.subr.bf16.mxu1 %v1490_v1 }
 0x1eb   :  { %1371 = vmatpush3.bf16.msra.mxu1 %v1490_v1 }
 0x1ec   :  { %1372 = vmatprep.subr.bf16.mxu1 %v1491_v2 }
 0x1ef   :  { %1373 = vmatpush3.bf16.msra.mxu1 %v1491_v2 }
 0x1f0   :  { %1374 = vmatprep.subr.bf16.mxu1 %v1492_v3 }
 0x1f3   :  { %1375 = vmatpush3.bf16.msra.mxu1 %v1492_v3 }
 0x1f4   :  { %1376 = vmatprep.subr.bf16.mxu1 %v1493_v4 }
 0x1f7   :  { %1377 = vmatpush3.bf16.msra.mxu1 %v1493_v4 }
 0x1f8   :  { %1378 = vmatprep.subr.bf16.mxu1 %v1494_v5 }
 0x1fb   :  { %1379 = vmatpush3.bf16.msra.mxu1 %v1494_v5 }
 0x1fc   :  { %1380 = vmatprep.subr.bf16.mxu1 %v1495_v6 }
 0x1ff   :  { %1381 = vmatpush3.bf16.msra.mxu1 %v1495_v6 }
 0x2b5   :  { %v355_v8 = vpop.f32.mrb[12].mxu1 }
 0x2b6   :  { %v356_v9 = vadd.f32 %v1182_v7, %v355_v8  ;;  %v1364_v10 = vpop.f32.mrb[13].mxu1 }
 0x2b7   :  { %v358_v11 = vpop.f32.mrb[14].mxu1 }
 0x2b8   :  { %1530 = vtanh.f32 %v356_v9  ;;  %v1365_v15 = vpop.f32.mrb[15].mxu1 }
 0x2b9   :  { %1532 = vtanh.f32 %v299_v16 }
 0x2ba   :  { %1534 = vtanh.f32 %v302_v17 }
 0x2bb   :  { %1536 = vtanh.f32 %v307_v18 }
 0x2bc   :  { %1538 = vtanh.f32 %v310_v21 }
 0x2c2   :  { %v1531_v23 = vpop.eup %1530 }
 0x2c3   :  { %v369_v24 = vrot.slane %v1531_v23, %v368_v22  ;;  %v1533_v28 = vpop.eup %1532 }
 0x2c4   :  { %v1535_v31 = vpop.eup %1534 }
 0x2c5   :  { %v370_v26 = vcombine.high %v369_v24, %v369_v24  ;;  %v377_v27 = vrot.slane %v369_v24, %v368_v22  ;;  %v1537_v32 = vpop.eup %1536 }
 0x2c6   :  { %v1539_v36 = vpop.eup %1538 }
 0x2c7   :  { %v388_v29 = vrot.slane %v377_v27, %v387_v25  ;;  %v384_v30 = vrot.slane %v370_v26, %v368_v22 }
 0x2c9   :  { %v395_v33 = vadd.f32 %v1533_v28, %v388_v29  ;;  %v396_v34 = vadd.f32 %v1535_v31, %v388_v29  ;;  %v392_v35 = vrot.slane %v384_v30, %v387_v25  ;;  %v1197_v29 = vld [vmem:[%s1876_s10 + $0x1] ss:$0 sm:$0xff] }
 0x2cb   :  { %v405_v37 = vpack.c.bf16 %v396_v34, %v395_v33  ;;  %v397_v38 = vadd.f32 %v1537_v32, %v392_v35  ;;  %v398_v39 = vadd.f32 %v1539_v36, %v392_v35  ;;  %v1198_v34 = vld [vmem:[%s1876_s10 + $0x2] ss:$0 sm:$0xff] }
 0x2cd   :  { %1382 = vmatprep.mubr.bf16.mxu1 %v405_v37  ;;  %v406_v40 = vpack.c.bf16 %v398_v39, %v397_v38 }
 0x2cf   :  { %1383 = vmatmul.mubr.bf16.vlgmr.msra.gmra.mrb[16].mxu1 %v406_v40 }
 0x3a2   :  { %v1384_v51 = vpop.f32.mrb[16].mxu1 }
 0x3a3   :  { %v509_v52 = vpop.f32.mrb[17].mxu1  ;;  %v518_v56 = vadd.f32 %v1384_v51, %v1188_v50 }
 0x3a4   :  { %v510_v53 = vadd.f32 %v1188_v50, %v509_v52  ;;  %v1385_v54 = vpop.f32.mrb[18].mxu1 }
 0x3a5   :  { %v512_v55 = vpop.f32.mrb[19].mxu1  ;;  %v521_v59 = vadd.f32 %v1385_v54, %v1188_v50  ;;  %v536_v62 = vmul.f32 %v518_v56, %v518_v56 }
 0x3a6   :  { %v513_v57 = vadd.f32 %v1188_v50, %v512_v55  ;;  %v534_v58 = vmul.f32 %v510_v53, %v510_v53 }
 0x3a7   :  { %v537_v1 = vmul.f32 %v521_v59, %v521_v59 }
 0x3a8   :  { %v524_v60 = vadd.f32 %v513_v57, %v510_v53  ;;  %v535_v61 = vmul.f32 %v513_v57, %v513_v57 }
 0x3aa   :  { %v525_v63 = vadd.f32 %v524_v60, %v518_v56  ;;  %v538_v0 = vadd.f32 %v535_v61, %v534_v58  ;;  %v1506_v60 = vld [vmem:[%s1875_s8 + $0x10] sm:$0xff]   ;;  %v1507_v61 = vld [vmem:[%s1875_s8 + $0x18] sm:$0xff]  }
 0x3ac   :  { %v526_v2 = vadd.f32 %v525_v63, %v521_v59  ;;  %v539_v3 = vadd.f32 %v538_v0, %v536_v62  ;;  %v1508_v62 = vld [vmem:[%s1875_s8 + $0x20] sm:$0xff]   ;;  %v1510_v63 = vld [vmem:[%s1875_s8 + $0x30] sm:$0xff]   ;;  %v1511_v0 = vld [vmem:[%s1875_s8 + $0x38] sm:$0xff]  }
 0x3ae   :  { %v527_v4 = vrot.slane %v526_v2, 4  ;;  %v540_v5 = vadd.f32 %v539_v3, %v537_v1 }
 0x3b0   :  { %v528_v6 = vadd.f32 %v527_v4, %v526_v2  ;;  %v541_v7 = vrot.slane %v540_v5, 4 }
 0x3b2   :  { %v529_v8 = vrot.slane %v528_v6, 2  ;;  %v542_v9 = vadd.f32 %v541_v7, %v540_v5  ;;  %v1512_v5 = vld [vmem:[%s1875_s8 + $0x80] sm:$0xff]  }
 0x3b4   :  { %v530_v10 = vadd.f32 %v529_v8, %v528_v6  ;;  %v543_v11 = vrot.slane %v542_v9, 2 }
 0x3b6   :  { %v531_v12 = vrot.slane %v530_v10, 1  ;;  %v544_v13 = vadd.f32 %v543_v11, %v542_v9  ;;  %v1513_v11 = vld [vmem:[%s1875_s8 + $0x88] sm:$0xff]  }
 0x3b8   :  { %v532_v14 = vadd.f32 %v531_v12, %v530_v10  ;;  %v545_v15 = vrot.slane %v544_v13, 1 }
 0x3ba   :  { %v533_v16 = vmul.f32 0.03125, %v532_v14  ;;  %v546_v17 = vadd.f32 %v545_v15, %v544_v13  ;;  %v1514_v13 = vld [vmem:[%s1875_s8 + $0x90] sm:$0xff]   ;;  %v1515_v14 = vld [vmem:[%s1875_s8 + $0x98] sm:$0xff]   ;;  %v1516_v15 = vld [vmem:[%s1875_s8 + $0xa0] sm:$0xff]  }
 0x3bc   :  { %v547_v18 = vmul.f32 0.03125, %v546_v17  ;;  %v548_v19 = vmul.f32 %v533_v16, %v533_v16  ;;  %v552_v21 = vsub.f32 %v513_v57, %v533_v16  ;;  %v551_v22 = vsub.f32 %v510_v53, %v533_v16  ;;  %v1518_v17 = vld [vmem:[%s1875_s8 + $0xb0] sm:$0xff]  }
 0x3bd   :  { %v553_v23 = vsub.f32 %v518_v56, %v533_v16  ;;  %v554_v24 = vsub.f32 %v521_v59, %v533_v16  ;;  %v1505_v56 = vld [vmem:[%s1875_s8 + $0x8] sm:$0xff]  }
 0x3be   :  { %v549_v25 = vsub.f32 %v547_v18, %v548_v19  ;;  %v1517_v16 = vld [vmem:[%s1875_s8 + $0xa8] sm:$0xff]   ;;  %v1519_v18 = vld [vmem:[%s1875_s8 + $0xb8] sm:$0xff]  }
 0x3c0   :  { %v550_v26 = vmax.f32 %v549_v25, 0.0  ;;  %v1520_v25 = vld [vmem:[%s1877_s9] sm:$0xff]  }
 0x3c1   :  { %1446 = vmatprep.subr.bf16.mxu1 %v1520_v25 }
 0x3c2   :  { %v555_v27 = vadd.f32 1e-06, %v550_v26  ;;  %1447 = vmatpush3.bf16.msra.mxu1 %v1520_v25  ;;  %v1521_v26 = vld [vmem:[%s1877_s9 + $0x8] sm:$0xff]  }
 0x3c3   :  { %1448 = vmatprep.subr.bf16.mxu1 %v1521_v26 }
 0x3c4   :  { %1540 = vrsqrt.f32 %v555_v27  ;;  %v1523_v27 = vld [vmem:[%s1877_s9 + $0x18] sm:$0xff]  }
 0x3c6   :  { %1449 = vmatpush3.bf16.msra.mxu1 %v1521_v26 }
 0x3c7   :  { %1450 = vmatprep.subr.bf16.mxu1 %v1522_v20 }
 0x3ca   :  { %1451 = vmatpush3.bf16.msra.mxu1 %v1522_v20 }
 0x3cb   :  { %1452 = vmatprep.subr.bf16.mxu1 %v1523_v27 }
 0x3ce   :  { %v1541_v28 = vpop.eup %1540  ;;  %1453 = vmatpush3.bf16.msra.mxu1 %v1523_v27 }
 0x3cf   :  { %v558_v30 = vmul.f32 %v1541_v28, %v552_v21  ;;  %v557_v31 = vmul.f32 %v1541_v28, %v551_v22  ;;  %v559_v32 = vmul.f32 %v1541_v28, %v553_v23  ;;  %v560_v33 = vmul.f32 %v1541_v28, %v554_v24  ;;  %v1524_v28 = vld [vmem:[%s1877_s9 + $0x20] sm:$0xff]  }
 0x3d0   :  { %1454 = vmatprep.subr.bf16.mxu1 %v1524_v28 }
 0x3d1   :  { %v566_v35 = vmul.f32 %v1197_v29, %v558_v30  ;;  %v565_v36 = vmul.f32 %v1197_v29, %v557_v31  ;;  %v567_v37 = vmul.f32 %v1197_v29, %v559_v32  ;;  %v568_v38 = vmul.f32 %v1197_v29, %v560_v33  ;;  %v1525_v29 = vld [vmem:[%s1877_s9 + $0x28] sm:$0xff]   ;;  %v1526_v30 = vld [vmem:[%s1877_s9 + $0x30] sm:$0xff]   ;;  %v1527_v31 = vld [vmem:[%s1877_s9 + $0x38] sm:$0xff]  }
 0x3d2   :  { %1455 = vmatpush3.bf16.msra.mxu1 %v1524_v28  ;;  %v1215_v32 = vld [vmem:[%s1876_s10 + $0x3] ss:$0 sm:$0xff] }
 0x3d3   :  { %v573_v39 = vadd.f32 %v1198_v34, %v565_v36  ;;  %v574_v40 = vadd.f32 %v1198_v34, %v566_v35  ;;  %v575_v41 = vadd.f32 %v1198_v34, %v567_v37  ;;  %v576_v42 = vadd.f32 %v1198_v34, %v568_v38  ;;  %1456 = vmatprep.subr.bf16.mxu1 %v1525_v29 }
 0x3d5   :  { %vm577_vm4 = vcmp.ge.f32.partialorder %v573_v39, 0.0  ;;  %vm578_vm5 = vcmp.ge.f32.partialorder %v574_v40, 0.0  ;;  %v581_v43 = vmul.f32 0.2, %v573_v39  ;;  %v582_v44 = vmul.f32 0.2, %v574_v40 }
 0x3d6   :  { %vm579_vm6 = vcmp.ge.f32.partialorder %v575_v41, 0.0  ;;  %vm580_vm7 = vcmp.ge.f32.partialorder %v576_v42, 0.0  ;;  %v583_v45 = vmul.f32 0.2, %v575_v41  ;;  %v584_v46 = vmul.f32 0.2, %v576_v42  ;;  %1457 = vmatpush3.bf16.msra.mxu1 %v1525_v29 }
 0x3d7   :  { %v1731_v47 = vsel %vm577_vm4, %v573_v39, %v581_v43  ;;  %v1733_v48 = vsel %vm578_vm5, %v574_v40, %v582_v44  ;;  %1458 = vmatprep.subr.bf16.mxu1 %v1526_v30 }
 0x3d8   :  { %v589_v50 = vpack.c.bf16 %v1733_v48, %v1731_v47  ;;  %v709_v51 = vrot.slane %v1731_v47, 7  ;;  %v711_v52 = vrot.slane %v1733_v48, 7  ;;  %v1740_v53 = vsel %vm579_vm6, %v575_v41, %v583_v45 }
 0x3d9   :  { %v1742_v54 = vsel %vm580_vm7, %v576_v42, %v584_v46  ;;  %v710_v1 = vrot.slane %v1740_v53, 7  ;;  %v839_v3 = vrot.slane %v1731_v47, 1  ;;  %v841_v4 = vrot.slane %v1733_v48, 1 }
 0x3da   :  { %1402 = vmatprep.mubr.bf16.mxu0 %v589_v50  ;;  %v590_v55 = vpack.c.bf16 %v1742_v54, %v1740_v53  ;;  %v716_v57 = vsel %vm715_vm8, %v709_v51, %v711_v52  ;;  %v718_v58 = vsel %vm715_vm8, %v711_v52, %v709_v51  ;;  %v712_v2 = vrot.slane %v1742_v54, 7  ;;  %1459 = vmatpush3.bf16.msra.mxu1 %v1526_v30 }
 0x3db   :  { %v720_v59 = vpack.c.bf16 %v716_v57, %v718_v58  ;;  %v844_v8 = vsel %vm843_vm9, %v839_v3, %v841_v4  ;;  %v846_v9 = vsel %vm843_vm9, %v841_v4, %v839_v3  ;;  %v840_v19 = vrot.slane %v1740_v53, 1  ;;  %1460 = vmatprep.subr.bf16.mxu1 %v1527_v31 }
 0x3dc   :  { %1403 = vmatmul.mubr.bf16.vlgmr.msra.gmra.mrb[0].mxu0 %v590_v55  ;;  %v717_v6 = vsel %vm715_vm8, %v710_v1, %v712_v2  ;;  %v719_v7 = vsel %vm715_vm8, %v712_v2, %v710_v1  ;;  %v848_v12 = vpack.c.bf16 %v846_v9, %v844_v8  ;;  %v842_v21 = vrot.slane %v1742_v54, 1 }
 0x3dd   :  { %1407 = vmatpush3.bf16.msra.mxu0 %v1719_v49  ;;  %1422 = vmatprep.mubr.bf16.mxu0 %v720_v59  ;;  %v1509_v49 = vld [vmem:[%s1875_s8 + $0x28] sm:$0xff]   ;;  %v721_v10 = vpack.c.bf16 %v717_v6, %v719_v7 }
 0x3de   :  { %1408 = vmatprep.subr.bf16.mxu0 %v1505_v56  ;;  %v845_v22 = vsel %vm843_vm9, %v840_v19, %v842_v21  ;;  %v847_v23 = vsel %vm843_vm9, %v842_v21, %v840_v19  ;;  %1461 = vmatpush3.bf16.msra.mxu1 %v1527_v31  ;;  %v1257_v19 = vld [vmem:[%s1876_s10 + $0x5] ss:$0 sm:$0xff] }
 0x3df   :  { %v849_v24 = vpack.c.bf16 %v847_v23, %v845_v22 }
 0x3e1   :  { %1409 = vmatpush3.bf16.msra.mxu0 %v1505_v56 }
 0x3e2   :  { %1410 = vmatprep.subr.bf16.mxu0 %v1506_v60 }
 0x3e5   :  { %1411 = vmatpush3.bf16.msra.mxu0 %v1506_v60 }
 0x3e6   :  { %1412 = vmatprep.subr.bf16.mxu0 %v1507_v61 }
 0x3e9   :  { %1413 = vmatpush3.bf16.msra.mxu0 %v1507_v61 }
 0x3ea   :  { %1414 = vmatprep.subr.bf16.mxu0 %v1508_v62 }
 0x3ed   :  { %1415 = vmatpush3.bf16.msra.mxu0 %v1508_v62 }
 0x3ee   :  { %1416 = vmatprep.subr.bf16.mxu0 %v1509_v49 }
 0x3f1   :  { %1417 = vmatpush3.bf16.msra.mxu0 %v1509_v49 }
 0x3f2   :  { %1418 = vmatprep.subr.bf16.mxu0 %v1510_v63 }
 0x3f5   :  { %1419 = vmatpush3.bf16.msra.mxu0 %v1510_v63 }
 0x3f6   :  { %1420 = vmatprep.subr.bf16.mxu0 %v1511_v0 }
 0x3f9   :  { %1421 = vmatpush3.bf16.msra.mxu0 %v1511_v0 }
 0x3fa   :  { %1426 = vmatprep.subr.bf16.mxu0 %v1512_v5 }
 0x3fc   :  { %1423 = vmatmul.mubr.bf16.vlgmr.msra.gmra.mrb[0].mxu0 %v721_v10 }
 0x3fd   :  { %1427 = vmatpush3.bf16.msra.mxu0 %v1512_v5  ;;  %1442 = vmatprep.mubr.bf16.mxu0 %v848_v12 }
 0x3fe   :  { %1428 = vmatprep.subr.bf16.mxu0 %v1513_v11 }
 0x401   :  { %1429 = vmatpush3.bf16.msra.mxu0 %v1513_v11 }
 0x402   :  { %1430 = vmatprep.subr.bf16.mxu0 %v1514_v13 }
 0x405   :  { %1431 = vmatpush3.bf16.msra.mxu0 %v1514_v13 }
 0x406   :  { %1432 = vmatprep.subr.bf16.mxu0 %v1515_v14 }
 0x409   :  { %1433 = vmatpush3.bf16.msra.mxu0 %v1515_v14  ;;  %v1256_v14 = vld [vmem:[%s1876_s10 + $0x4] ss:$0 sm:$0xff] }
 0x40a   :  { %1434 = vmatprep.subr.bf16.mxu0 %v1516_v15 }
 0x40d   :  { %1435 = vmatpush3.bf16.msra.mxu0 %v1516_v15 }
 0x40e   :  { %1436 = vmatprep.subr.bf16.mxu0 %v1517_v16 }
 0x411   :  { %1437 = vmatpush3.bf16.msra.mxu0 %v1517_v16 }
 0x412   :  { %1438 = vmatprep.subr.bf16.mxu0 %v1518_v17 }
 0x415   :  { %1439 = vmatpush3.bf16.msra.mxu0 %v1518_v17 }
 0x416   :  { %1440 = vmatprep.subr.bf16.mxu0 %v1519_v18 }
 0x419   :  { %1441 = vmatpush3.bf16.msra.mxu0 %v1519_v18 }
 0x41c   :  { %1443 = vmatmul.mubr.bf16.vlgmr.msra.gmra.mrb[0].mxu0 %v849_v24 }
 0x4ef   :  { %v1444_v33 = vpop.f32.mrb[0].mxu0 }
 0x4f0   :  { %v949_v34 = vpop.f32.mrb[1].mxu0  ;;  %v1466_v38 = vadd.f32 %v1444_v33, %v1215_v32 }
 0x4f1   :  { %v1467_v35 = vadd.f32 %v1215_v32, %v949_v34  ;;  %v1445_v36 = vpop.f32.mrb[2].mxu0 }
 0x4f2   :  { %v952_v37 = vpop.f32.mrb[3].mxu0  ;;  %v1468_v41 = vadd.f32 %v1445_v36, %v1215_v32  ;;  %v980_v44 = vmul.f32 %v1466_v38, %v1466_v38 }
 0x4f3   :  { %v1469_v39 = vadd.f32 %v1215_v32, %v952_v37  ;;  %v978_v40 = vmul.f32 %v1467_v35, %v1467_v35 }
 0x4f4   :  { %v981_v50 = vmul.f32 %v1468_v41, %v1468_v41 }
 0x4f5   :  { %v968_v42 = vadd.f32 %v1469_v39, %v1467_v35  ;;  %v979_v43 = vmul.f32 %v1469_v39, %v1469_v39 }
 0x4f7   :  { %v969_v45 = vadd.f32 %v1466_v38, %v968_v42  ;;  %v982_v46 = vadd.f32 %v979_v43, %v978_v40 }
 0x4f9   :  { %v970_v51 = vadd.f32 %v1468_v41, %v969_v45  ;;  %v983_v52 = vadd.f32 %v982_v46, %v980_v44 }
 0x4fb   :  { %v971_v55 = vrot.slane %v970_v51, 4  ;;  %v984_v56 = vadd.f32 %v983_v52, %v981_v50 }
 0x4fd   :  { %v972_v57 = vadd.f32 %v971_v55, %v970_v51  ;;  %v985_v58 = vrot.slane %v984_v56, 4 }
 0x4ff   :  { %v973_v59 = vrot.slane %v972_v57, 2  ;;  %v986_v60 = vadd.f32 %v985_v58, %v984_v56 }
 0x501   :  { %v974_v61 = vadd.f32 %v973_v59, %v972_v57  ;;  %v987_v62 = vrot.slane %v986_v60, 2 }
 0x503   :  { %v975_v49 = vrot.slane %v974_v61, 1  ;;  %v988_v63 = vadd.f32 %v987_v62, %v986_v60 }
 0x505   :  { %v976_v0 = vadd.f32 %v975_v49, %v974_v61  ;;  %v989_v1 = vrot.slane %v988_v63, 1 }
 0x507   :  { %v977_v2 = vmul.f32 0.03125, %v976_v0  ;;  %v990_v3 = vadd.f32 %v989_v1, %v988_v63 }
 0x509   :  { %v991_v4 = vmul.f32 0.03125, %v990_v3  ;;  %v992_v5 = vmul.f32 %v977_v2, %v977_v2  ;;  %v996_v6 = vsub.f32 %v1469_v39, %v977_v2  ;;  %v997_v7 = vsub.f32 %v1466_v38, %v977_v2 }
 0x50a   :  { %v998_v8 = vsub.f32 %v1468_v41, %v977_v2  ;;  %v995_v9 = vsub.f32 %v1467_v35, %v977_v2 }
 0x50b   :  { %v993_v10 = vsub.f32 %v991_v4, %v992_v5 }
 0x50d   :  { %v994_v11 = vmax.f32 %v993_v10, 0.0 }
 0x50f   :  { %v999_v12 = vadd.f32 1e-06, %v994_v11 }
 0x511   :  { %1542 = vrsqrt.f32 %v999_v12 }
 0x51b   :  { %v1543_v13 = vpop.eup %1542 }
 0x51c   :  { %v1002_v15 = vmul.f32 %v1543_v13, %v996_v6  ;;  %v1003_v16 = vmul.f32 %v1543_v13, %v997_v7  ;;  %v1004_v17 = vmul.f32 %v1543_v13, %v998_v8  ;;  %v1001_v18 = vmul.f32 %v1543_v13, %v995_v9 }
 0x51e   :  { %v1010_v21 = vmul.f32 %v1256_v14, %v1002_v15  ;;  %v1011_v22 = vmul.f32 %v1256_v14, %v1003_v16  ;;  %v1012_v23 = vmul.f32 %v1256_v14, %v1004_v17  ;;  %v1009_v24 = vmul.f32 %v1256_v14, %v1001_v18 }
 0x520   :  { %v1018_v25 = vadd.f32 %v1257_v19, %v1010_v21  ;;  %v1017_v26 = vadd.f32 %v1257_v19, %v1009_v24  ;;  %v1019_v20 = vadd.f32 %v1257_v19, %v1011_v22  ;;  %v1020_v27 = vadd.f32 %v1257_v19, %v1012_v23 }
 0x522   :  { %vm1021_vm10 = vcmp.ge.f32.partialorder %v1017_v26, 0.0  ;;  %vm1022_vm11 = vcmp.ge.f32.partialorder %v1018_v25, 0.0  ;;  %v1025_v28 = vmul.f32 0.2, %v1017_v26  ;;  %v1026_v29 = vmul.f32 0.2, %v1018_v25 }
 0x523   :  { %vm1023_vm12 = vcmp.ge.f32.partialorder %v1019_v20, 0.0  ;;  %vm1024_vm13 = vcmp.ge.f32.partialorder %v1020_v27, 0.0  ;;  %v1027_v30 = vmul.f32 0.2, %v1019_v20  ;;  %v1028_v31 = vmul.f32 0.2, %v1020_v27 }
 0x524   :  { %v1029_v32 = vsel %vm1021_vm10, %v1017_v26, %v1025_v28  ;;  %v1030_v33 = vsel %vm1022_vm11, %v1018_v25, %v1026_v29 }
 0x525   :  { %v1033_v34 = vadd.f32 %v1029_v32, %v1731_v47  ;;  %v1034_v35 = vadd.f32 %v1030_v33, %v1733_v48  ;;  %v1031_v36 = vsel %vm1023_vm12, %v1019_v20, %v1027_v30  ;;  %v1032_v37 = vsel %vm1024_vm13, %v1020_v27, %v1028_v31  ;;  %v1258_v47 = vld [vmem:[%s1878_s11] ss:$0 sm:$0xff] }
 0x526   :  { %v1035_v38 = vadd.f32 %v1031_v36, %v1740_v53  ;;  %v1036_v39 = vadd.f32 %v1032_v37, %v1742_v54 }
 0x527   :  { %v1037_v40 = vmul.f32 0.70710677, %v1033_v34  ;;  %v1038_v41 = vmul.f32 0.70710677, %v1034_v35 }
 0x528   :  { %v1039_v42 = vmul.f32 0.70710677, %v1035_v38  ;;  %v1040_v43 = vmul.f32 0.70710677, %v1036_v39 }
 0x529   :  { %v1041_v44 = vpack.c.bf16 %v1038_v41, %v1037_v40 }
 0x52a   :  { %v1042_v45 = vpack.c.bf16 %v1040_v43, %v1039_v42 }
 0x52b   :  { %1462 = vmatprep.mubr.bf16.mxu1 %v1041_v44 }
 0x52c   :  { %1463 = vmatmul.mubr.bf16.vlgmr.msra.gmra.mrb[20].mxu1 %v1042_v45 }
 0x5ff   :  { %v1464_v46 = vpop.f32.mrb[20].mxu1 }
 0x600   :  { %v1157_v48 = vadd.f32 %v1464_v46, %v1258_v47  ;;  %v1148_v50 = vpop.f32.mrb[21].mxu1 }
 0x601   :  { %v1149_v51 = vadd.f32 %v1258_v47, %v1148_v50  ;;  %v1465_v53 = vpop.f32.mrb[22].mxu1 }
 0x602   :  { %1166 = vst.msk [vmem:[%s1879_s12 + $0x10] sm:$0xff] %vm1163_vm14, %v1157_v48  ;;  %v1160_v54 = vadd.f32 %v1465_v53, %v1258_v47  ;;  %v1151_v52 = vpop.f32.mrb[23].mxu1 }
 0x603   :  { %1164 = vst.msk [vmem:[%s1879_s12] sm:$0xff] %vm1163_vm14, %v1149_v51  ;;  %v1152_v55 = vadd.f32 %v1258_v47, %v1151_v52 }
 0x604   :  { %1167 = vst.msk [vmem:[%s1879_s12 + $0x18] sm:$0xff] %vm1163_vm14, %v1160_v54 }
 0x605   :  { %1165 = vst.msk [vmem:[%s1879_s12 + $0x8] sm:$0xff] %vm1163_vm14, %v1152_v55 }

</bundles_post_ra>
